<compile_context>
chip_gen: v7x
topology: tpu7x:2x2x1
jax: 0.10.0
libtpu: 0.0.40
codegen_flags: <defaults>
</compile_context>

<pallas_src>
import functools

import jax
import jax.numpy as jnp
from jax.experimental import pallas as pl
from jax.experimental.pallas import tpu as pltpu


# ----------------------------------------------------------------------------
# Pallas kernel
# ----------------------------------------------------------------------------
def _xattn_kernel(x_ref, bias_ref, media_ref, gamma_ref, beta_ref,
                  wq_ref, wk_ref, wv_ref, wo_ref, out_ref, *,
                  heads, dim_head, scale):
    # ---- LayerNorm in f32 (torch defaults: eps=1e-5, elementwise affine) ----
    x = x_ref[0].astype(jnp.float32)                                     # (Tn, D)
    mu = jnp.mean(x, axis=-1, keepdims=True)
    var = jnp.mean(jnp.square(x - mu), axis=-1, keepdims=True)
    xn = (x - mu) * jax.lax.rsqrt(var + 1e-5)
    xn = xn * gamma_ref[...] + beta_ref[...]                             # (Tn, D)

    # ---- projections: bf16 operands, f32 accumulation on the MXU ----
    xn_b = xn.astype(jnp.bfloat16)
    med_b = media_ref[0]                                                 # (TM, D) bf16
    q = jnp.dot(xn_b, wq_ref[...], preferred_element_type=jnp.float32)   # (Tn, inner)
    k = jnp.dot(med_b, wk_ref[...], preferred_element_type=jnp.float32)  # (TM, inner)
    v = jnp.dot(med_b, wv_ref[...], preferred_element_type=jnp.float32)  # (TM, inner)

    q_b = (q * scale).astype(jnp.bfloat16)
    k_b = k.astype(jnp.bfloat16)
    v_b = v.astype(jnp.bfloat16)

    # ---- split heads -> (H, rows, Dh); single batched contraction over heads ----
    def split_heads(z):
        return jnp.stack(
            [z[:, h * dim_head:(h + 1) * dim_head] for h in range(heads)], axis=0)

    qh = split_heads(q_b)                                                # (H, Tn, Dh)
    kh = split_heads(k_b)                                                # (H, TM, Dh)
    vh = split_heads(v_b)                                                # (H, TM, Dh)

    sim = jnp.einsum('hqd,hkd->hqk', qh, kh,
                     preferred_element_type=jnp.float32)                 # (H, Tn, TM) f32

    # Additive mask bias (0 or -finfo(f32).max): since |sim| << ulp(finfo.max),
    # sim + (-finfo.max) == -finfo.max exactly, i.e. identical to masked_fill.
    sim = sim + bias_ref[0][None, :, :]
    sim = sim - jnp.max(sim, axis=-1, keepdims=True)
    p = jnp.exp(sim)
    attn = p * pl.reciprocal(jnp.sum(p, axis=-1, keepdims=True), approx=True)
    # NOTE: PyTorch's `attn.masked_fill(text_without_media_mask, 0.)` result is
    # discarded (not in-place) in the reference module -> a no-op, intentionally skipped.

    o = jnp.einsum('hqk,hkd->hqd', attn.astype(jnp.bfloat16), vh,
                   preferred_element_type=jnp.float32)                   # (H, Tn, Dh)
    o = jnp.concatenate([o[h] for h in range(heads)], axis=-1)           # (Tn, inner)
    out_ref[0] = jnp.dot(o.astype(jnp.bfloat16), wo_ref[...],
                         preferred_element_type=jnp.float32).astype(out_ref.dtype)


# ----------------------------------------------------------------------------
# Wrapper: reshape / mask-bias glue + pallas_call
# ----------------------------------------------------------------------------
def _pick_text_tile(n):
    for cand in (256, 128, 64, 32, 16, 8):
        if n % cand == 0:
            return cand
    return n  # small / ragged: one full-extent tile


def masked_cross_attention(params, x, media, media_locations=None, aug_exist_idx=None,
                           *, heads, dim_head, only_attend_immediate_media=True,
                           txt_block=None):
    b, n_txt, dim = x.shape
    assert media.ndim == 4, "expects media of shape (b, t, m, d)"
    _, t, m, dm = media.shape
    assert dm == dim
    tm = t * m
    inner = heads * dim_head
    scale = dim_head ** (-0.5)

    # bf16 operands for the MXU (accumulation stays f32 in-kernel).
    media_flat = media.reshape(b, tm, dim).astype(jnp.bfloat16)
    wq = params["wq"].astype(jnp.bfloat16)
    wk = params["wkv"][:, :inner].astype(jnp.bfloat16)
    wv = params["wkv"][:, inner:].astype(jnp.bfloat16)
    wo = params["wo"].astype(jnp.bfloat16)
    gamma = params["gamma"].astype(jnp.float32)
    beta = params["beta"].astype(jnp.float32)

    # Additive mask bias: 0 where attending is allowed, -finfo(f32).max otherwise.
    neg = -jnp.finfo(jnp.float32).max
    bias = jnp.zeros((b, n_txt, tm), jnp.float32)
    if media_locations is not None:
        text_time = jnp.cumsum(media_locations.astype(jnp.int32), axis=-1)      # (b, n)
        media_time = jnp.repeat(jnp.arange(t, dtype=jnp.int32) + 1, m)          # (tm,)
        if only_attend_immediate_media:
            ok = text_time[:, :, None] == media_time[None, None, :]
        else:
            ok = text_time[:, :, None] >= media_time[None, None, :]
        bias = jnp.where(ok, bias, neg)
    if aug_exist_idx is not None:
        aug = jnp.repeat(aug_exist_idx.astype(jnp.int32), m, axis=-1)           # (b, tm)
        bias = jnp.where(aug[:, None, :] == 1, bias, neg)

    tn = txt_block if txt_block is not None else _pick_text_tile(n_txt)
    assert n_txt % tn == 0
    n_tiles = n_txt // tn

    kernel = functools.partial(_xattn_kernel, heads=heads, dim_head=dim_head, scale=scale)

    out = pl.pallas_call(
        kernel,
        out_shape=jax.ShapeDtypeStruct((b, n_txt, dim), x.dtype),
        grid_spec=pltpu.PrefetchScalarGridSpec(
            num_scalar_prefetch=0,
            grid=(b, n_tiles),
            in_specs=[
                pl.BlockSpec((1, tn, dim),  lambda bi, ti: (bi, ti, 0)),   # x
                pl.BlockSpec((1, tn, tm),   lambda bi, ti: (bi, ti, 0)),   # mask bias (f32)
                pl.BlockSpec((1, tm, dim),  lambda bi, ti: (bi, 0, 0)),    # media (bf16)
                pl.BlockSpec((1, dim),      lambda bi, ti: (0, 0)),        # LN gamma
                pl.BlockSpec((1, dim),      lambda bi, ti: (0, 0)),        # LN beta
                pl.BlockSpec((dim, inner),  lambda bi, ti: (0, 0)),        # Wq (bf16)
                pl.BlockSpec((dim, inner),  lambda bi, ti: (0, 0)),        # Wk (bf16)
                pl.BlockSpec((dim, inner),  lambda bi, ti: (0, 0)),        # Wv (bf16)
                pl.BlockSpec((inner, dim),  lambda bi, ti: (0, 0)),        # Wo (bf16)
            ],
            out_specs=pl.BlockSpec((1, tn, dim), lambda bi, ti: (bi, ti, 0)),
        ),
        compiler_params=pltpu.CompilerParams(
            dimension_semantics=("parallel", "parallel"),
            vmem_limit_bytes=64 * 1024 * 1024,   # fits physical VMEM on v5e/v6e/v7x
        ),
    )(x, bias, media_flat, gamma, beta, wq, wk, wv, wo)
    return out


# ----------------------------------------------------------------------------
# Pure-JAX reference (mirrors the PyTorch forward) for a correctness check.
# ----------------------------------------------------------------------------
def reference(params, x, media, media_locations, aug_exist_idx,
              *, heads, dim_head, only_attend_immediate_media=True):
    b, n_txt, dim = x.shape
    _, t, m, _ = media.shape
    tm = t * m
    inner = heads * dim_head
    scale = dim_head ** (-0.5)

    mu = jnp.mean(x, axis=-1, keepdims=True)
    var = jnp.mean(jnp.square(x - mu), axis=-1, keepdims=True)
    xn = (x - mu) / jnp.sqrt(var + 1e-5) * params["gamma"][0] + params["beta"][0]

    q = xn @ params["wq"]
    kv = media.reshape(b, tm, dim) @ params["wkv"]
    k, v = kv[..., :inner], kv[..., inner:]

    def split_heads(z):
        return z.reshape(z.shape[0], z.shape[1], heads, dim_head).transpose(0, 2, 1, 3)

    q, k, v = split_heads(q) * scale, split_heads(k), split_heads(v)
    sim = jnp.einsum("bhid,bhjd->bhij", q, k)

    neg = -jnp.finfo(sim.dtype).max
    if media_locations is not None:
        text_time = jnp.cumsum(media_locations.astype(jnp.int32), -1)
        media_time = jnp.repeat(jnp.arange(t, dtype=jnp.int32) + 1, m)
        op = (lambda a, c: a == c) if only_attend_immediate_media else (lambda a, c: a >= c)
        mask = op(text_time[:, None, :, None], media_time[None, None, None, :])
        sim = jnp.where(mask, sim, neg)
    if aug_exist_idx is not None:
        aug_exp = jnp.repeat(aug_exist_idx.astype(jnp.int32), m, axis=-1)
        mask = (aug_exp[:, None, None, :] == 1)
        sim = jnp.where(mask, sim, neg)

    sim = sim - jnp.max(sim, axis=-1, keepdims=True)
    attn = jax.nn.softmax(sim, axis=-1)
    out = jnp.einsum("bhij,bhjd->bhid", attn, v)
    out = out.transpose(0, 2, 1, 3).reshape(b, n_txt, inner)
    return out @ params["wo"]


# ----------------------------------------------------------------------------
if __name__ == "__main__":
    dim, heads, dim_head = 32, 4, 16
    inner = heads * dim_head
    b, n_txt, t, m = 2, 8, 2, 4

    key = jax.random.PRNGKey(0)
    k_x, k_med, k_q, k_kv, k_o, k_loc = jax.random.split(key, 6)

    params = {
        "gamma": jnp.ones((1, dim), jnp.float32),
        "beta": jnp.zeros((1, dim), jnp.float32),
        "wq": 0.02 * jax.random.normal(k_q, (dim, inner), jnp.float32),
        "wkv": 0.02 * jax.random.normal(k_kv, (dim, 2 * inner), jnp.float32),
        "wo": 0.02 * jax.random.normal(k_o, (inner, dim), jnp.float32),
    }

    x = jax.random.normal(k_x, (b, n_txt, dim), jnp.float32)
    media = jax.random.normal(k_med, (b, t, m, dim), jnp.float32)
    media_locations = jax.random.bernoulli(k_loc, 0.3, (b, n_txt))             # bool (b, n)
    aug_exist_idx = jnp.array([[1, 1], [1, 0]], dtype=jnp.int32)               # (b, t)

    out = masked_cross_attention(
        params, x, media, media_locations, aug_exist_idx,
        heads=heads, dim_head=dim_head, only_attend_immediate_media=True)
    out = jax.block_until_ready(out)

    ref = reference(params, x, media, media_locations, aug_exist_idx,
                    heads=heads, dim_head=dim_head, only_attend_immediate_media=True)
    assert out.shape == (b, n_txt, dim)
    # bf16 MXU operands + approx reciprocal -> relaxed (relative) tolerance vs f32 reference.
    err = float(jnp.max(jnp.abs(out - ref)))
    ref_scale = float(jnp.max(jnp.abs(ref)))
    assert err <= 5e-2 * ref_scale + 1e-6, f"mismatch vs reference: err={err}, ref_max={ref_scale}"

    print("KERNEL_OK")
</pallas_src>

<mosaic_0001>
module attributes {stable_mosaic.version = 11 : i64} {
  func.func @_xattn_kernel(%arg0: i32, %arg1: i32, %arg2: memref<1x8x32xf32, #tpu.memory_space<vmem>>, %arg3: memref<1x8x8xf32, #tpu.memory_space<vmem>>, %arg4: memref<1x8x32xbf16, #tpu.memory_space<vmem>>, %arg5: memref<1x32xf32, #tpu.memory_space<vmem>>, %arg6: memref<1x32xf32, #tpu.memory_space<vmem>>, %arg7: memref<32x64xbf16, #tpu.memory_space<vmem>>, %arg8: memref<32x64xbf16, #tpu.memory_space<vmem>>, %arg9: memref<32x64xbf16, #tpu.memory_space<vmem>>, %arg10: memref<64x32xbf16, #tpu.memory_space<vmem>>, %arg11: memref<1x8x32xf32, #tpu.memory_space<vmem>>) attributes {dimension_semantics = [#tpu.dimension_semantics<parallel>, #tpu.dimension_semantics<parallel>], iteration_bounds = array<i64: 2, 1>, scalar_prefetch = 0 : i64, scratch_operands = 0 : i64, tpu.core_type = #tpu.core_type<tc>, window_params = [{transform_indices = @transform_0, window_bounds = array<i64: 1, 8, 32>}, {transform_indices = @transform_1, window_bounds = array<i64: 1, 8, 8>}, {transform_indices = @transform_2, window_bounds = array<i64: 1, 8, 32>}, {pipeline_mode = #tpu.pipeline_mode<synchronous>, transform_indices = @transform_3, window_bounds = array<i64: 1, 32>}, {pipeline_mode = #tpu.pipeline_mode<synchronous>, transform_indices = @transform_4, window_bounds = array<i64: 1, 32>}, {pipeline_mode = #tpu.pipeline_mode<synchronous>, transform_indices = @transform_5, window_bounds = array<i64: 32, 64>}, {pipeline_mode = #tpu.pipeline_mode<synchronous>, transform_indices = @transform_6, window_bounds = array<i64: 32, 64>}, {pipeline_mode = #tpu.pipeline_mode<synchronous>, transform_indices = @transform_7, window_bounds = array<i64: 32, 64>}, {pipeline_mode = #tpu.pipeline_mode<synchronous>, transform_indices = @transform_8, window_bounds = array<i64: 64, 32>}, {transform_indices = @transform_9, window_bounds = array<i64: 1, 8, 32>}]} {
    %c0 = arith.constant 0 : index
    %c0_0 = arith.constant 0 : index
    %c0_1 = arith.constant 0 : index
    %0 = vector.load %arg2[%c0, %c0_0, %c0_1] : memref<1x8x32xf32, #tpu.memory_space<vmem>>, vector<1x8x32xf32>
    %1 = vector.shape_cast %0 : vector<1x8x32xf32> to vector<8x32xf32>
    %cst = arith.constant dense<0.000000e+00> : vector<8xf32>
    %2 = vector.multi_reduction <add>, %1, %cst [1] : vector<8x32xf32> to vector<8xf32>
    %3 = vector.shape_cast %2 : vector<8xf32> to vector<8x1xf32>
    %cst_2 = arith.constant 3.200000e+01 : f32
    %4 = vector.broadcast %cst_2 : f32 to vector<8x1xf32>
    %5 = arith.divf %3, %4 : vector<8x1xf32>
    %6 = vector.broadcast %5 : vector<8x1xf32> to vector<8x32xf32>
    %7 = arith.subf %1, %6 : vector<8x32xf32>
    %8 = arith.mulf %7, %7 : vector<8x32xf32>
    %cst_3 = arith.constant dense<0.000000e+00> : vector<8xf32>
    %9 = vector.multi_reduction <add>, %8, %cst_3 [1] : vector<8x32xf32> to vector<8xf32>
    %10 = vector.shape_cast %9 : vector<8xf32> to vector<8x1xf32>
    %cst_4 = arith.constant 3.200000e+01 : f32
    %11 = vector.broadcast %cst_4 : f32 to vector<8x1xf32>
    %12 = arith.divf %10, %11 : vector<8x1xf32>
    %13 = vector.broadcast %5 : vector<8x1xf32> to vector<8x32xf32>
    %14 = arith.subf %1, %13 : vector<8x32xf32>
    %cst_5 = arith.constant 9.99999974E-6 : f32
    %15 = vector.broadcast %cst_5 : f32 to vector<8x1xf32>
    %16 = arith.addf %12, %15 : vector<8x1xf32>
    %17 = math.rsqrt %16 : vector<8x1xf32>
    %18 = vector.broadcast %17 : vector<8x1xf32> to vector<8x32xf32>
    %19 = arith.mulf %14, %18 : vector<8x32xf32>
    %c0_6 = arith.constant 0 : index
    %c0_7 = arith.constant 0 : index
    %20 = vector.load %arg5[%c0_6, %c0_7] : memref<1x32xf32, #tpu.memory_space<vmem>>, vector<1x32xf32>
    %21 = vector.broadcast %20 : vector<1x32xf32> to vector<8x32xf32>
    %22 = arith.mulf %19, %21 : vector<8x32xf32>
    %c0_8 = arith.constant 0 : index
    %c0_9 = arith.constant 0 : index
    %23 = vector.load %arg6[%c0_8, %c0_9] : memref<1x32xf32, #tpu.memory_space<vmem>>, vector<1x32xf32>
    %24 = vector.broadcast %23 : vector<1x32xf32> to vector<8x32xf32>
    %25 = arith.addf %22, %24 : vector<8x32xf32>
    %26 = arith.truncf %25 : vector<8x32xf32> to vector<8x32xbf16>
    %c0_10 = arith.constant 0 : index
    %c0_11 = arith.constant 0 : index
    %c0_12 = arith.constant 0 : index
    %27 = vector.load %arg4[%c0_10, %c0_11, %c0_12] : memref<1x8x32xbf16, #tpu.memory_space<vmem>>, vector<1x8x32xbf16>
    %28 = vector.shape_cast %27 : vector<1x8x32xbf16> to vector<8x32xbf16>
    %c0_13 = arith.constant 0 : index
    %c0_14 = arith.constant 0 : index
    %29 = vector.load %arg7[%c0_13, %c0_14] : memref<32x64xbf16, #tpu.memory_space<vmem>>, vector<32x64xbf16>
    %cst_15 = arith.constant dense<0.000000e+00> : vector<8x64xf32>
    %30 = tpu.matmul %26, %29, %cst_15 {dimension_numbers = #tpu.dot_dimension_numbers<[1], [0], [0], [1], [0, 0, 1, 1], [], []>} : vector<8x32xbf16>, vector<32x64xbf16>, vector<8x64xf32> -> vector<8x64xf32>
    %c0_16 = arith.constant 0 : index
    %c0_17 = arith.constant 0 : index
    %31 = vector.load %arg8[%c0_16, %c0_17] : memref<32x64xbf16, #tpu.memory_space<vmem>>, vector<32x64xbf16>
    %cst_18 = arith.constant dense<0.000000e+00> : vector<8x64xf32>
    %32 = tpu.matmul %28, %31, %cst_18 {dimension_numbers = #tpu.dot_dimension_numbers<[1], [0], [0], [1], [0, 0, 1, 1], [], []>} : vector<8x32xbf16>, vector<32x64xbf16>, vector<8x64xf32> -> vector<8x64xf32>
    %c0_19 = arith.constant 0 : index
    %c0_20 = arith.constant 0 : index
    %33 = vector.load %arg9[%c0_19, %c0_20] : memref<32x64xbf16, #tpu.memory_space<vmem>>, vector<32x64xbf16>
    %cst_21 = arith.constant dense<0.000000e+00> : vector<8x64xf32>
    %34 = tpu.matmul %28, %33, %cst_21 {dimension_numbers = #tpu.dot_dimension_numbers<[1], [0], [0], [1], [0, 0, 1, 1], [], []>} : vector<8x32xbf16>, vector<32x64xbf16>, vector<8x64xf32> -> vector<8x64xf32>
    %cst_22 = arith.constant 2.500000e-01 : f32
    %35 = vector.broadcast %cst_22 : f32 to vector<8x64xf32>
    %36 = arith.mulf %30, %35 : vector<8x64xf32>
    %37 = arith.truncf %36 : vector<8x64xf32> to vector<8x64xbf16>
    %38 = arith.truncf %32 : vector<8x64xf32> to vector<8x64xbf16>
    %39 = arith.truncf %34 : vector<8x64xf32> to vector<8x64xbf16>
    %40 = vector.extract_strided_slice %37 {offsets = [0, 0], sizes = [8, 16], strides = [1, 1]} : vector<8x64xbf16> to vector<8x16xbf16>
    %41 = vector.extract_strided_slice %37 {offsets = [0, 16], sizes = [8, 16], strides = [1, 1]} : vector<8x64xbf16> to vector<8x16xbf16>
    %42 = vector.extract_strided_slice %37 {offsets = [0, 32], sizes = [8, 16], strides = [1, 1]} : vector<8x64xbf16> to vector<8x16xbf16>
    %43 = vector.extract_strided_slice %37 {offsets = [0, 48], sizes = [8, 16], strides = [1, 1]} : vector<8x64xbf16> to vector<8x16xbf16>
    %44 = vector.shape_cast %40 : vector<8x16xbf16> to vector<1x8x16xbf16>
    %45 = vector.shape_cast %41 : vector<8x16xbf16> to vector<1x8x16xbf16>
    %46 = vector.shape_cast %42 : vector<8x16xbf16> to vector<1x8x16xbf16>
    %47 = vector.shape_cast %43 : vector<8x16xbf16> to vector<1x8x16xbf16>
    %48 = tpu.concatenate %44, %45, %46, %47 in 0 : vector<1x8x16xbf16>, vector<1x8x16xbf16>, vector<1x8x16xbf16>, vector<1x8x16xbf16> -> vector<4x8x16xbf16>
    %49 = vector.extract_strided_slice %38 {offsets = [0, 0], sizes = [8, 16], strides = [1, 1]} : vector<8x64xbf16> to vector<8x16xbf16>
    %50 = vector.extract_strided_slice %38 {offsets = [0, 16], sizes = [8, 16], strides = [1, 1]} : vector<8x64xbf16> to vector<8x16xbf16>
    %51 = vector.extract_strided_slice %38 {offsets = [0, 32], sizes = [8, 16], strides = [1, 1]} : vector<8x64xbf16> to vector<8x16xbf16>
    %52 = vector.extract_strided_slice %38 {offsets = [0, 48], sizes = [8, 16], strides = [1, 1]} : vector<8x64xbf16> to vector<8x16xbf16>
    %53 = vector.shape_cast %49 : vector<8x16xbf16> to vector<1x8x16xbf16>
    %54 = vector.shape_cast %50 : vector<8x16xbf16> to vector<1x8x16xbf16>
    %55 = vector.shape_cast %51 : vector<8x16xbf16> to vector<1x8x16xbf16>
    %56 = vector.shape_cast %52 : vector<8x16xbf16> to vector<1x8x16xbf16>
    %57 = tpu.concatenate %53, %54, %55, %56 in 0 : vector<1x8x16xbf16>, vector<1x8x16xbf16>, vector<1x8x16xbf16>, vector<1x8x16xbf16> -> vector<4x8x16xbf16>
    %58 = vector.extract_strided_slice %39 {offsets = [0, 0], sizes = [8, 16], strides = [1, 1]} : vector<8x64xbf16> to vector<8x16xbf16>
    %59 = vector.extract_strided_slice %39 {offsets = [0, 16], sizes = [8, 16], strides = [1, 1]} : vector<8x64xbf16> to vector<8x16xbf16>
    %60 = vector.extract_strided_slice %39 {offsets = [0, 32], sizes = [8, 16], strides = [1, 1]} : vector<8x64xbf16> to vector<8x16xbf16>
    %61 = vector.extract_strided_slice %39 {offsets = [0, 48], sizes = [8, 16], strides = [1, 1]} : vector<8x64xbf16> to vector<8x16xbf16>
    %62 = vector.shape_cast %58 : vector<8x16xbf16> to vector<1x8x16xbf16>
    %63 = vector.shape_cast %59 : vector<8x16xbf16> to vector<1x8x16xbf16>
    %64 = vector.shape_cast %60 : vector<8x16xbf16> to vector<1x8x16xbf16>
    %65 = vector.shape_cast %61 : vector<8x16xbf16> to vector<1x8x16xbf16>
    %66 = tpu.concatenate %62, %63, %64, %65 in 0 : vector<1x8x16xbf16>, vector<1x8x16xbf16>, vector<1x8x16xbf16>, vector<1x8x16xbf16> -> vector<4x8x16xbf16>
    "tpu.trace_start"() <{level = 10 : i32, message = "hqd,hkd->hqk"}> : () -> ()
    %cst_23 = arith.constant dense<0.000000e+00> : vector<4x8x8xf32>
    %67 = tpu.matmul %48, %57, %cst_23 {dimension_numbers = #tpu.dot_dimension_numbers<[2], [2], [1], [1], [0, 0, 0, 1, 1, 1], [0], [0]>} : vector<4x8x16xbf16>, vector<4x8x16xbf16>, vector<4x8x8xf32> -> vector<4x8x8xf32>
    "tpu.trace_stop"() : () -> ()
    %c0_24 = arith.constant 0 : index
    %c0_25 = arith.constant 0 : index
    %c0_26 = arith.constant 0 : index
    %68 = vector.load %arg3[%c0_24, %c0_25, %c0_26] : memref<1x8x8xf32, #tpu.memory_space<vmem>>, vector<1x8x8xf32>
    %69 = vector.shape_cast %68 : vector<1x8x8xf32> to vector<8x8xf32>
    %70 = vector.shape_cast %69 : vector<8x8xf32> to vector<1x8x8xf32>
    %71 = vector.broadcast %70 : vector<1x8x8xf32> to vector<4x8x8xf32>
    %72 = arith.addf %67, %71 : vector<4x8x8xf32>
    %cst_27 = arith.constant dense<0xFF800000> : vector<4x8xf32>
    %73 = vector.multi_reduction <maximumf>, %72, %cst_27 [2] : vector<4x8x8xf32> to vector<4x8xf32>
    %74 = vector.shape_cast %73 : vector<4x8xf32> to vector<4x8x1xf32>
    %75 = vector.broadcast %74 : vector<4x8x1xf32> to vector<4x8x8xf32>
    %76 = arith.subf %72, %75 : vector<4x8x8xf32>
    %77 = math.exp %76 : vector<4x8x8xf32>
    %cst_28 = arith.constant dense<0.000000e+00> : vector<4x8xf32>
    %78 = vector.multi_reduction <add>, %77, %cst_28 [2] : vector<4x8x8xf32> to vector<4x8xf32>
    %79 = vector.shape_cast %78 : vector<4x8xf32> to vector<4x8x1xf32>
    %80 = tpu.reciprocal %79 {approx = true} : vector<4x8x1xf32> -> vector<4x8x1xf32>
    %81 = vector.broadcast %80 : vector<4x8x1xf32> to vector<4x8x8xf32>
    %82 = arith.mulf %77, %81 : vector<4x8x8xf32>
    %83 = arith.truncf %82 : vector<4x8x8xf32> to vector<4x8x8xbf16>
    "tpu.trace_start"() <{level = 10 : i32, message = "hqk,hkd->hqd"}> : () -> ()
    %cst_29 = arith.constant dense<0.000000e+00> : vector<4x8x16xf32>
    %84 = tpu.matmul %83, %66, %cst_29 {dimension_numbers = #tpu.dot_dimension_numbers<[2], [1], [1], [2], [0, 0, 0, 1, 1, 2], [0], [0]>} : vector<4x8x8xbf16>, vector<4x8x16xbf16>, vector<4x8x16xf32> -> vector<4x8x16xf32>
    "tpu.trace_stop"() : () -> ()
    %85 = vector.extract_strided_slice %84 {offsets = [0, 0, 0], sizes = [1, 8, 16], strides = [1, 1, 1]} : vector<4x8x16xf32> to vector<1x8x16xf32>
    %86 = vector.shape_cast %85 : vector<1x8x16xf32> to vector<8x16xf32>
    %87 = vector.extract_strided_slice %84 {offsets = [1, 0, 0], sizes = [1, 8, 16], strides = [1, 1, 1]} : vector<4x8x16xf32> to vector<1x8x16xf32>
    %88 = vector.shape_cast %87 : vector<1x8x16xf32> to vector<8x16xf32>
    %89 = vector.extract_strided_slice %84 {offsets = [2, 0, 0], sizes = [1, 8, 16], strides = [1, 1, 1]} : vector<4x8x16xf32> to vector<1x8x16xf32>
    %90 = vector.shape_cast %89 : vector<1x8x16xf32> to vector<8x16xf32>
    %91 = vector.extract_strided_slice %84 {offsets = [3, 0, 0], sizes = [1, 8, 16], strides = [1, 1, 1]} : vector<4x8x16xf32> to vector<1x8x16xf32>
    %92 = vector.shape_cast %91 : vector<1x8x16xf32> to vector<8x16xf32>
    %93 = tpu.concatenate %86, %88, %90, %92 in 1 : vector<8x16xf32>, vector<8x16xf32>, vector<8x16xf32>, vector<8x16xf32> -> vector<8x64xf32>
    %94 = arith.truncf %93 : vector<8x64xf32> to vector<8x64xbf16>
    %c0_30 = arith.constant 0 : index
    %c0_31 = arith.constant 0 : index
    %95 = vector.load %arg10[%c0_30, %c0_31] : memref<64x32xbf16, #tpu.memory_space<vmem>>, vector<64x32xbf16>
    %cst_32 = arith.constant dense<0.000000e+00> : vector<8x32xf32>
    %96 = tpu.matmul %94, %95, %cst_32 {dimension_numbers = #tpu.dot_dimension_numbers<[1], [0], [0], [1], [0, 0, 1, 1], [], []>} : vector<8x64xbf16>, vector<64x32xbf16>, vector<8x32xf32> -> vector<8x32xf32>
    %c0_33 = arith.constant 0 : index
    %c0_34 = arith.constant 0 : index
    %c0_35 = arith.constant 0 : index
    %97 = vector.load %arg11[%c0_33, %c0_34, %c0_35] : memref<1x8x32xf32, #tpu.memory_space<vmem>>, vector<1x8x32xf32>
    %98 = vector.shape_cast %97 : vector<1x8x32xf32> to vector<8x32xf32>
    %99 = vector.shape_cast %96 : vector<8x32xf32> to vector<1x8x32xf32>
    tpu.vector_store %arg11[%c0_33, %c0_34, %c0_35], %99 {strides = array<i32>} : memref<1x8x32xf32, #tpu.memory_space<vmem>>, vector<1x8x32xf32>,
    return
  }
  func.func @transform_0(%arg0: i32, %arg1: i32) -> (i32, i32, i32) {
    %c0_i32 = arith.constant 0 : i32
    %c0_i32_0 = arith.constant 0 : i32
    return %arg0, %arg1, %c0_i32 : i32, i32, i32
  }
  func.func @transform_1(%arg0: i32, %arg1: i32) -> (i32, i32, i32) {
    %c0_i32 = arith.constant 0 : i32
    %c0_i32_0 = arith.constant 0 : i32
    return %arg0, %arg1, %c0_i32 : i32, i32, i32
  }
  func.func @transform_2(%arg0: i32, %arg1: i32) -> (i32, i32, i32) {
    %c0_i32 = arith.constant 0 : i32
    %c0_i32_0 = arith.constant 0 : i32
    %c0_i32_1 = arith.constant 0 : i32
    return %arg0, %c0_i32, %c0_i32_0 : i32, i32, i32
  }
  func.func @transform_3(%arg0: i32, %arg1: i32) -> (i32, i32) {
    %c0_i32 = arith.constant 0 : i32
    %c0_i32_0 = arith.constant 0 : i32
    %c0_i32_1 = arith.constant 0 : i32
    return %c0_i32, %c0_i32_0 : i32, i32
  }
  func.func @transform_4(%arg0: i32, %arg1: i32) -> (i32, i32) {
    %c0_i32 = arith.constant 0 : i32
    %c0_i32_0 = arith.constant 0 : i32
    %c0_i32_1 = arith.constant 0 : i32
    return %c0_i32, %c0_i32_0 : i32, i32
  }
  func.func @transform_5(%arg0: i32, %arg1: i32) -> (i32, i32) {
    %c0_i32 = arith.constant 0 : i32
    %c0_i32_0 = arith.constant 0 : i32
    %c0_i32_1 = arith.constant 0 : i32
    return %c0_i32, %c0_i32_0 : i32, i32
  }
  func.func @transform_6(%arg0: i32, %arg1: i32) -> (i32, i32) {
    %c0_i32 = arith.constant 0 : i32
    %c0_i32_0 = arith.constant 0 : i32
    %c0_i32_1 = arith.constant 0 : i32
    return %c0_i32, %c0_i32_0 : i32, i32
  }
  func.func @transform_7(%arg0: i32, %arg1: i32) -> (i32, i32) {
    %c0_i32 = arith.constant 0 : i32
    %c0_i32_0 = arith.constant 0 : i32
    %c0_i32_1 = arith.constant 0 : i32
    return %c0_i32, %c0_i32_0 : i32, i32
  }
  func.func @transform_8(%arg0: i32, %arg1: i32) -> (i32, i32) {
    %c0_i32 = arith.constant 0 : i32
    %c0_i32_0 = arith.constant 0 : i32
    %c0_i32_1 = arith.constant 0 : i32
    return %c0_i32, %c0_i32_0 : i32, i32
  }
  func.func @transform_9(%arg0: i32, %arg1: i32) -> (i32, i32, i32) {
    %c0_i32 = arith.constant 0 : i32
    %c0_i32_0 = arith.constant 0 : i32
    return %arg0, %arg1, %c0_i32 : i32, i32, i32
  }
}

</mosaic_0001>

<bundles_post_ra>
// kernel: tpu_custom_call.1
= control target key start
LH: loop header
LB: loop body
LE: loop exit
PB: predicated region body
PF: predicated region fallthrough
CT: control target
= control target key end

     0   :  { %s2735_s0 = inlined_call_operand.hbm [shape: f32[2,8,32], index: 0, kind: input, shape index: {}]   ;;  %s2736_s1 = inlined_call_operand.hbm [shape: f32[2,8,8], index: 1, kind: input, shape index: {}]   ;;  %s2737_s2 = inlined_call_operand.hbm [shape: bf16[2,8,32], index: 2, kind: input, shape index: {}]   ;;  %s2738_s3 = inlined_call_operand.hbm [shape: f32[1,32], index: 3, kind: input, shape index: {}]   ;;  %s2739_s4 = inlined_call_operand.hbm [shape: f32[1,32], index: 4, kind: input, shape index: {}]   ;;  %s2740_s5 = inlined_call_operand.hbm [shape: bf16[32,64], index: 5, kind: input, shape index: {}]   ;;  %s2741_s6 = inlined_call_operand.hbm [shape: bf16[32,64], index: 6, kind: input, shape index: {}]   ;;  %s2742_s7 = inlined_call_operand.hbm [shape: bf16[32,64], index: 7, kind: input, shape index: {}]   ;;  %s2743_s8 = inlined_call_operand.hbm [shape: bf16[64,32], index: 8, kind: input, shape index: {}]   ;;  %s2744_s9 = inlined_call_operand.hbm [shape: f32[2,8,32], index: 9, kind: output, shape index: {}]  }
   0x1   :  { %2770 = sst [smem:[#allocation30_spill]] %s2736_s1 }
   0x2   :  { %2771 = sst [smem:[#allocation31_spill]] %s2738_s3 }
   0x3   :  { %2772 = sst [smem:[#allocation32_spill]] %s2740_s5 }
   0x4   :  { %2773 = sst [smem:[#allocation33_spill]] %s2742_s7 }
   0x5   :  { %2774 = sst [smem:[#allocation34_spill]] %s2744_s9 }
   0x6   :  { %14 = vsyncpa [#allocation3], 0 }
   0x7   :  { %16 = vsyncpa [#allocation3 + $0x1], 0 }
   0x8   :  { %17 = vsyncpa [#allocation6], 0 }
   0x9   :  { %19 = vsyncpa [#allocation6 + $0x1], 0 }
   0xa   :  { %20 = vsyncpa [#allocation9], 0 }
   0xb   :  { %21 = vsyncpa [#allocation12], 0 }
   0xc   :  { %22 = vsyncpa [#allocation15], 0 }
   0xd   :  { %23 = vsyncpa [#allocation4], 0 }
   0xe   :  { %25 = vsyncpa [#allocation4 + $0x1], 0  ;;  %s2234_s30 = smov 0   ;;  %s2236_s10 = smov 0  }
   0xf   :  { %s2238_s11 = smov 0   ;;  %s2240_s12 = smov 0  }
  0x10   :  { %s2242_s13 = smov 0   ;;  %s2244_s14 = smov 0  }
  0x11 LB: > { %2775 = sst [smem:[#allocation24_spill]] %s2142_s30  ;;  %s2265_s15 = sadd.s32 4294967295, %s2162_s14   ;;  %s2162_s14 = sphi %s2244_s14, %s31_s14   ;;  %s2158_s13 = sphi %s2242_s13, %s2825_s13   ;;  %s2154_s12 = sphi %s2240_s12, %s2824_s12   ;;  %s2150_s11 = sphi %s2238_s11, %s2820_s11   ;;  %s2146_s10 = sphi %s2236_s10, %s2823_s10   ;;  %s2142_s30 = sphi %s2234_s30, %s2822_s30  }
  0x12   : > { %2776 = sst [smem:[#allocation25_spill]] %s2150_s11  ;;  %p1468_p0 = scmp.ge.s32.totalorder %s2162_s14, 1 }
  0x13   : > { %2777 = sst [smem:[#allocation26_spill]] %s2162_s14  ;;  %p2745_p1 = scmp.eq.s32.totalorder %s2265_s15, 0 }
  0x14   : > { %p284_p2 = scmp.lt.s32.totalorder %s2162_s14, 3  ;;  %s2164_s17 = smov [#allocation8]  }
  0x15   : > { %s297_s18 = sshll.u32 %s2164_s17, 4  ;;  %s2165_s19 = smov [#allocation11]   ;;  %s298_s18 = int_to_ptr.vmem [resolvable:$true] %s297_s18 }
  0x16   : > { %p2270_p3 = pnand %p1468_p0, %p284_p2  ;;  %s318_s20 = sshll.u32 %s2165_s19, 4  ;;  %s2283_s20 = int_to_ptr.vmem [resolvable:$true] %s318_s20 }
  0x17   : > { %s2166_s22 = smov [#allocation14]   ;;  %s2780_s3 = sld [smem:[#allocation31_spill]] }
  0x18   : > { %s2778_s16 = scalar_select %p2270_p3, 1, 0 }
  0x19   : > { %p1667_p5 = pneg %p2270_p3  ;;  %s2285_s23 = sshll.u32 %s2166_s22, 4  ;;  %s345_s23 = int_to_ptr.vmem [resolvable:$true] %s2285_s23 }
  0x1b   : > { %p2279_p6 = pnand %p1667_p5, %p2745_p1 }
  0x1d   : > { %s2779_s21 = scalar_select %p2279_p6, 1, 0 }
  0x1e   : > { %s1806_s26 = scalar_lea.hbm %s2780_s3, 16  ;;  %p2295_p8 = pneg %p2279_p6 }
  0x1f   : > { %p1807_p7 = scmp.ne.s32.totalorder %s2780_s3, %s1806_s26  ;;  %p1813_p11 = scmp.lt.u32.totalorder %s1806_s26, %s2780_s3 }
  0x20   : > { %s2781_s29 = scalar_select %p2295_p8, 1, 0 }
  0x21   : > { %p1809_p9 = pnand %p2295_p8, %p1807_p7 }
  0x23   : > { %p1810_p10 = pneg %p1809_p9 }
  0x25   : > { %p1815_p12 = pnand %p1813_p11, %p1810_p10 }
  0x27   : > { %1818 = shalt.err (!%p1815_p12)
}
  0x28   : > { %s1819_s22 = scalar_lea.vmem %s298_s18, 16  ;;  %s1826_s24 = scalar_lea.vmem %s298_s18, 32 }
  0x29   : > { %p1820_p13 = scmp.ne.s32.totalorder %s298_s18, %s1819_s22  ;;  %p1827_p5 = scmp.lt.s32.totalorder %s298_s18, %s298_s18 }
  0x2a   : > { %p1828_p4 = scmp.lt.s32.totalorder %s1826_s24, %s1819_s22 }
  0x2b   : > { %p1822_p0 = pnand %p1820_p13, %p2295_p8 }
  0x2c   : > { %p1829_p1 = por %p1828_p4, %p1827_p5 }
  0x2d   : > { %p1823_p2 = pneg %p1822_p0 }
  0x2f   : > { %p1830_p3 = pnand %p1829_p1, %p1823_p2 }
  0x31   : > { %1833 = shalt.err (!%p1830_p3)
}
  0x32   : > { %1670 = dma.hbm_to_vmem [thread:$0]  (!%p2279_p6), %s2780_s3, 16, %s298_s18, [#allocation9]  }
  0x33   : > { %s2782_s5 = sld [smem:[#allocation32_spill]] }
  0x39   : > { %s1834_s17 = scalar_lea.hbm %s2782_s5, 256 }
  0x3a   : > { %p1835_p7 = scmp.ne.s32.totalorder %s2782_s5, %s1834_s17  ;;  %p1841_p1 = scmp.lt.u32.totalorder %s1834_s17, %s2782_s5 }
  0x3c   : > { %p1837_p9 = pnand %p1835_p7, %p2295_p8 }
  0x3e   : > { %p1838_p4 = pneg %p1837_p9 }
  0x40   : > { %p1843_p3 = pnand %p1841_p1, %p1838_p4 }
  0x42   : > { %1846 = shalt.err (!%p1843_p3)
}
  0x43   : > { %s1847_s18 = scalar_lea.vmem %s2283_s20, 256  ;;  %p1855_p13 = scmp.lt.s32.totalorder %s2283_s20, %s2283_s20 }
  0x44   : > { %p1848_p10 = scmp.ne.s32.totalorder %s2283_s20, %s1847_s18  ;;  %p1856_p0 = scmp.lt.s32.totalorder %s1847_s18, %s1847_s18 }
  0x46   : > { %p1850_p11 = pnand %p1848_p10, %p2295_p8  ;;  %p1857_p2 = por %p1856_p0, %p1855_p13 }
  0x48   : > { %p1851_p12 = pneg %p1850_p11 }
  0x4a   : > { %p1858_p5 = pnand %p1857_p2, %p1851_p12 }
  0x4c   : > { %1861 = shalt.err (!%p1858_p5)
}
  0x4d   : > { %s2748_s9 = smov 64   ;;  %s2750_s25 = smov 4  }
  0x4e   : > { %1676 = dma.hbm_to_vmem [thread:$0]  (!%p2279_p6), %s2782_s5, 256, %s2283_s20, [#allocation12], %s2748_s9, %s2748_s9, %s2750_s25  }
  0x4f   : > { %s2783_s7 = sld [smem:[#allocation33_spill]] }
  0x55   : > { %s1862_s19 = scalar_lea.hbm %s2783_s7, 256 }
  0x56   : > { %p1863_p7 = scmp.ne.s32.totalorder %s2783_s7, %s1862_s19  ;;  %p1869_p1 = scmp.lt.u32.totalorder %s1862_s19, %s2783_s7 }
  0x58   : > { %p1865_p9 = pnand %p1863_p7, %p2295_p8 }
  0x5a   : > { %p1866_p4 = pneg %p1865_p9 }
  0x5c   : > { %p1871_p3 = pnand %p1869_p1, %p1866_p4 }
  0x5e   : > { %1874 = shalt.err (!%p1871_p3)
}
  0x5f   : > { %s1875_s27 = scalar_lea.vmem %s345_s23, 256  ;;  %p1883_p13 = scmp.lt.s32.totalorder %s345_s23, %s345_s23 }
  0x60   : > { %p1876_p10 = scmp.ne.s32.totalorder %s345_s23, %s1875_s27  ;;  %p1884_p0 = scmp.lt.s32.totalorder %s1875_s27, %s1875_s27 }
  0x62   : > { %p1878_p11 = pnand %p1876_p10, %p2295_p8  ;;  %p1885_p2 = por %p1884_p0, %p1883_p13 }
  0x64   : > { %p1879_p12 = pneg %p1878_p11 }
  0x66   : > { %p1886_p5 = pnand %p1885_p2, %p1879_p12 }
  0x68   : > { %1889 = shalt.err (!%p1886_p5)
}
  0x69   : > { %1682 = dma.hbm_to_vmem [thread:$0]  (!%p2279_p6), %s2783_s7, 256, %s345_s23, [#allocation15], %s2748_s9, %s2748_s9, %s2750_s25  }
  0x6a   : > { %s1467_s26 = sadd.s32 4294967294, %s2162_s14   ;;  %s43_s28 = sadd.s32 1, %s2158_s13 }
  0x6b   : > { %s52_s17 = sadd.s32 1, %s2150_s11  ;;  %p45_p7 = scmp.ge.s32.totalorder %s43_s28, 2 }
  0x6c   : > { %p59_p9 = scmp.ne.s32.totalorder %s2150_s11, %s2146_s10  ;;  %p60_p4 = scmp.eq.s32.totalorder %s2162_s14, 0 }
  0x6d   : > { %p65_p1 = scmp.ne.s32.totalorder %s2146_s10, %s2142_s30  ;;  %s2827_s28 = smov (%p45_p7, %s43_s28), 0 }
  0x6e   : > { %2784 = sst [smem:[#allocation27_spill]] %s2827_s28  ;;  %p2369_p3 = por %p60_p4, %p59_p9 }
  0x6f   : > { %p2786_p10 = scmp.eq.s32.totalorder %s2265_s15, 0  ;;  %s47_s22 = ssub.s32 %s2158_s13, %s2827_s28 }
  0x70   : > { %p271_p12 = scmp.eq.s32.totalorder %s2265_s15, 1  ;;  %p50_p13 = scmp.eq.s32.totalorder %s47_s22, 0 }
  0x71   : > { %p2375_p11 = por %p2786_p10, %p65_p1  ;;  %p277_p0 = scmp.eq.s32.totalorder %s1467_s26, 1 }
  0x72   : > { %p2382_p2 = por %p271_p12, %p59_p9  ;;  %p1706_p5 = scmp.lt.s32.totalorder %s2162_s14, 2 }
  0x73   : > { %s2787_s23 = scalar_select %p2375_p11, 1, 0 }
  0x74   : > { %s2788_s24 = scalar_select %p2382_p2, 1, 0 }
  0x75   : > { %s2388_s18 = scalar_select %p50_p13, %s2150_s11, %s52_s17  }
  0x76   : > { %p2390_p7 = por %p277_p0, %p65_p1  ;;  %s2395_s3 = sand.u32 1, %s2150_s11  }
  0x77   : > { %2789 = sst [smem:[#allocation28_spill]] %s2388_s18  ;;  %s2756_s20 = sshll.u32 %s2395_s3, 3 }
  0x78   : > { %s2790_s27 = scalar_select %p2390_p7, 1, 0 }
  0x79   : > { %s2757_s9 = sshll.u32 %s2158_s13, 7  ;;  %p2401_p4 = pnand %p1706_p5, %p2369_p3 }
  0x7a   : > { %2791 = sst [smem:[#allocation29_spill]] %s2790_s27  ;;  %s390_s22 = sand.u32 1, %s2162_s14  }
  0x7b   : > { %s2792_s26 = scalar_select %p2401_p4, 1, 0 }
  0x7c   : > { %s2793_s1 = sld [smem:[#allocation30_spill]]  ;;  %s394_s7 = scalar_lea.vmem [#allocation5], %s2756_s20 }
  0x7d   : > { %s402_s28 = sshll.u32 %s394_s7, 4  ;;  %s2169_s19 = smov [#allocation10]   ;;  %s2415_s28 = int_to_ptr.vmem [resolvable:$true] %s402_s28 }
  0x7e   : > { %s2417_s18 = sshll.u32 %s2169_s19, 4  ;;  %s2419_s11 = scalar_lea.sflag [#allocation6], %s390_s22  ;;  %s309_s18 = int_to_ptr.vmem [resolvable:$true] %s2417_s18 }
  0x7f   : > { %p2425_p1 = pneg %p2401_p4 }
  0x81   : > { %s2794_s25 = scalar_select %p2425_p1, 1, 0 }
  0x82   : > { %s2411_s5 = scalar_lea.hbm %s2793_s1, %s2757_s9  ;;  %s1895_s20 = scalar_lea.hbm %s2793_s1, 256 }
  0x83   : > { %s1890_s14 = scalar_lea.hbm %s2411_s5, 128  ;;  %p1896_p12 = scmp.lt.u32.totalorder %s2411_s5, %s2793_s1 }
  0x84   : > { %p1891_p9 = scmp.ne.s32.totalorder %s2411_s5, %s1890_s14  ;;  %p1897_p13 = scmp.lt.u32.totalorder %s1895_s20, %s1890_s14 }
  0x85   : > { %p1899_p5 = scmp.lt.u32.totalorder %s1890_s14, %s2411_s5 }
  0x86   : > { %p1893_p3 = pnand %p2425_p1, %p1891_p9  ;;  %p1898_p0 = por %p1897_p13, %p1896_p12 }
  0x88   : > { %p1894_p10 = pneg %p1893_p3  ;;  %p1900_p7 = por %p1899_p5, %p1898_p0 }
  0x8a   : > { %p1901_p2 = pnand %p1900_p7, %p1894_p10 }
  0x8c   : > { %1904 = shalt.err (!%p1901_p2)
}
  0x8d   : > { %s1905_s22 = scalar_lea.vmem %s2415_s28, 128  ;;  %s2170_s17 = smov [#allocation5]  }
  0x8e   : > { %p1906_p9 = scmp.ne.s32.totalorder %s2415_s28, %s1905_s22  ;;  %s1910_s7 = sshll.u32 %s2170_s17, 4  ;;  %s1911_s7 = int_to_ptr.vmem [resolvable:$false] %s1910_s7 }
  0x8f   : > { %s1912_s9 = scalar_lea.vmem %s1911_s7, 256  ;;  %p1913_p6 = scmp.lt.s32.totalorder %s2415_s28, %s1911_s7 }
  0x90   : > { %p1908_p3 = pnand %p1906_p9, %p2425_p1  ;;  %p1914_p8 = scmp.lt.s32.totalorder %s1912_s9, %s1905_s22 }
  0x92   : > { %p1909_p11 = pneg %p1908_p3  ;;  %p1915_p12 = por %p1914_p8, %p1913_p6 }
  0x94   : > { %p1916_p13 = pnand %p1915_p12, %p1909_p11 }
  0x96   : > { %1919 = shalt.err (!%p1916_p13)
}
  0x97   : > { %1692 = dma.hbm_to_vmem [thread:$0]  (!%p2401_p4), %s2411_s5, 128, %s2415_s28, %s2419_s11  }
  0x98   : > { %s1920_s19 = scalar_lea.hbm %s2739_s4, 16  ;;  %p2795_p6 = scmp.ne.s32.totalorder %s2781_s29, 0 }
  0x99   : > { %p1921_p2 = scmp.ne.s32.totalorder %s2739_s4, %s1920_s19  ;;  %p1927_p7 = scmp.lt.u32.totalorder %s1920_s19, %s2739_s4 }
  0x9b   : > { %p1923_p8 = pnand %p1921_p2, %p2795_p6 }
  0x9d   : > { %p1924_p11 = pneg %p1923_p8 }
  0x9f   : > { %p1929_p10 = pnand %p1927_p7, %p1924_p11 }
  0xa1   : > { %1932 = shalt.err (!%p1929_p10)
}
  0xa2   : > { %s1933_s9 = scalar_lea.vmem %s309_s18, 16  ;;  %s1940_s5 = scalar_lea.vmem %s309_s18, 32 }
  0xa3   : > { %p1934_p0 = scmp.ne.s32.totalorder %s309_s18, %s1933_s9  ;;  %p1941_p3 = scmp.lt.s32.totalorder %s309_s18, %s309_s18 }
  0xa4   : > { %p1942_p12 = scmp.lt.s32.totalorder %s1940_s5, %s1933_s9 }
  0xa5   : > { %p1936_p5 = pnand %p1934_p0, %p2795_p6 }
  0xa6   : > { %p1943_p13 = por %p1942_p12, %p1941_p3 }
  0xa7   : > { %p1937_p9 = pneg %p1936_p5 }
  0xa9   : > { %p1944_p4 = pnand %p1943_p13, %p1937_p9 }
  0xab   : > { %1947 = shalt.err (!%p1944_p4)
}
  0xac   : > { %p2796_p2 = scmp.ne.s32.totalorder %s2779_s21, 0  ;;  %s2171_s14 = smov [#allocation13]  }
  0xad   : > { %s331_s20 = sshll.u32 %s2171_s14, 4  ;;  %s2172_s19 = smov [#allocation16]   ;;  %s332_s20 = int_to_ptr.vmem [resolvable:$true] %s331_s20 }
  0xae   : > { %1673 = dma.hbm_to_vmem [thread:$0]  (!%p2796_p2), %s2739_s4, 16, %s309_s18, [#allocation9]  }
  0xaf   : > { %s357_s17 = sshll.u32 %s2172_s19, 4  ;;  %s1948_s27 = scalar_lea.hbm %s2741_s6, 256  ;;  %s358_s17 = int_to_ptr.vmem [resolvable:$true] %s357_s17 }
  0xb0   : > { %p1949_p4 = scmp.ne.s32.totalorder %s2741_s6, %s1948_s27  ;;  %p1955_p7 = scmp.lt.u32.totalorder %s1948_s27, %s2741_s6 }
  0xb2   : > { %p1951_p8 = pnand %p1949_p4, %p2795_p6 }
  0xb4   : > { %p1952_p11 = pneg %p1951_p8 }
  0xb6   : > { %p1957_p10 = pnand %p1955_p7, %p1952_p11 }
  0xb8   : > { %1960 = shalt.err (!%p1957_p10)
}
  0xb9   : > { %s1961_s18 = scalar_lea.vmem %s332_s20, 256  ;;  %p1969_p3 = scmp.lt.s32.totalorder %s332_s20, %s332_s20 }
  0xba   : > { %p1962_p0 = scmp.ne.s32.totalorder %s332_s20, %s1961_s18  ;;  %p1970_p12 = scmp.lt.s32.totalorder %s1961_s18, %s1961_s18 }
  0xbc   : > { %p1964_p5 = pnand %p1962_p0, %p2795_p6  ;;  %p1971_p13 = por %p1970_p12, %p1969_p3 }
  0xbe   : > { %p1965_p9 = pneg %p1964_p5 }
  0xc0   : > { %p1972_p1 = pnand %p1971_p13, %p1965_p9 }
  0xc2   : > { %1975 = shalt.err (!%p1972_p1)
}
  0xc3   : > { %s2797_s28 = smov 4   ;;  %s2798_s14 = smov 64  }
  0xc4   : > { %1679 = dma.hbm_to_vmem [thread:$0]  (!%p2796_p2), %s2741_s6, 256, %s332_s20, [#allocation12], %s2798_s14, %s2798_s14, %s2797_s28  }
  0xc5   : > { %s1976_s7 = scalar_lea.hbm %s2743_s8, 512 }
  0xc6   : > { %p1977_p4 = scmp.ne.s32.totalorder %s2743_s8, %s1976_s7  ;;  %p1983_p11 = scmp.lt.u32.totalorder %s1976_s7, %s2743_s8 }
  0xc8   : > { %p1979_p1 = pnand %p1977_p4, %p2795_p6 }
  0xca   : > { %p1980_p8 = pneg %p1979_p1 }
  0xcc   : > { %p1985_p7 = pnand %p1983_p11, %p1980_p8 }
  0xce   : > { %1988 = shalt.err (!%p1985_p7)
}
  0xcf   : > { %s1989_s30 = scalar_lea.vmem %s358_s17, 512  ;;  %p1997_p9 = scmp.lt.s32.totalorder %s358_s17, %s358_s17 }
  0xd0   : > { %p1990_p10 = scmp.ne.s32.totalorder %s358_s17, %s1989_s30  ;;  %p1998_p3 = scmp.lt.s32.totalorder %s1989_s30, %s1989_s30 }
  0xd2   : > { %p1992_p0 = pnand %p1990_p10, %p2795_p6  ;;  %p1999_p12 = por %p1998_p3, %p1997_p9 }
  0xd4   : > { %p1993_p5 = pneg %p1992_p0 }
  0xd6   : > { %p2000_p13 = pnand %p1999_p12, %p1993_p5 }
  0xd8   : > { %2003 = shalt.err (!%p2000_p13)
}
  0xd9   : > { %1685 = dma.hbm_to_vmem [thread:$0]  (!%p2796_p2), %s2743_s8, 512, %s358_s17, [#allocation15], %s2798_s14, %s2798_s14, %s2797_s28  }
  0xda   : > { %s2799_s29 = sshll.u32 %s2158_s13, 7  ;;  %s2800_s9 = sshll.u32 %s2395_s3, 3 }
  0xdb   : > { %s2515_s7 = scalar_lea.hbm %s2735_s0, %s2799_s29  ;;  %s375_s21 = scalar_lea.vmem [#allocation2], %s2800_s9 }
  0xdc   : > { %s383_s5 = sshll.u32 %s375_s21, 4  ;;  %s1480_s1 = sshll.u32 %s2395_s3, 2  ;;  %s384_s5 = int_to_ptr.vmem [resolvable:$true] %s383_s5 }
  0xdd   : > { %s372_s18 = scalar_lea.sflag [#allocation3], %s2395_s3  ;;  %s2004_s30 = scalar_lea.hbm %s2515_s7, 128 }
  0xde   : > { %p2005_p6 = scmp.ne.s32.totalorder %s2515_s7, %s2004_s30  ;;  %p2801_p4 = scmp.ne.s32.totalorder %s2794_s25, 0 }
  0xdf   : > { %s2009_s14 = scalar_lea.hbm %s2735_s0, 256  ;;  %p2010_p8 = scmp.lt.u32.totalorder %s2515_s7, %s2735_s0 }
  0xe0   : > { %p2007_p2 = pnand %p2005_p6, %p2801_p4  ;;  %p2011_p11 = scmp.lt.u32.totalorder %s2009_s14, %s2004_s30 }
  0xe1   : > { %p2013_p10 = scmp.lt.u32.totalorder %s2004_s30, %s2515_s7 }
  0xe2   : > { %p2008_p1 = pneg %p2007_p2  ;;  %p2012_p7 = por %p2011_p11, %p2010_p8 }
  0xe4   : > { %p2014_p0 = por %p2013_p10, %p2012_p7 }
  0xe6   : > { %p2015_p5 = pnand %p2014_p0, %p2008_p1 }
  0xe8   : > { %2018 = shalt.err (!%p2015_p5)
}
  0xe9   : > { %s2019_s29 = scalar_lea.vmem %s384_s5, 128  ;;  %s2173_s19 = smov [#allocation2]  }
  0xea   : > { %p2020_p9 = scmp.ne.s32.totalorder %s384_s5, %s2019_s29  ;;  %s2024_s22 = sshll.u32 %s2173_s19, 4  ;;  %s2025_s22 = int_to_ptr.vmem [resolvable:$false] %s2024_s22 }
  0xeb   : > { %s2026_s9 = scalar_lea.vmem %s2025_s22, 256  ;;  %p2027_p13 = scmp.lt.s32.totalorder %s384_s5, %s2025_s22 }
  0xec   : > { %p2022_p3 = pnand %p2020_p9, %p2801_p4  ;;  %p2028_p6 = scmp.lt.s32.totalorder %s2026_s9, %s2019_s29 }
  0xee   : > { %p2023_p12 = pneg %p2022_p3  ;;  %p2029_p2 = por %p2028_p6, %p2027_p13 }
  0xf0   : > { %p2030_p8 = pnand %p2029_p2, %p2023_p12 }
  0xf2   : > { %2033 = shalt.err (!%p2030_p8)
}
  0xf3   : > { %p2802_p11 = scmp.ne.s32.totalorder %s2792_s26, 0  ;;  %s1481_s21 = sshll.u32 %s2158_s13, 6 }
  0xf4   : > { %s413_s30 = scalar_lea.vmem [#allocation7], %s1480_s1  ;;  %s418_s20 = scalar_lea.hbm %s2737_s2, %s1481_s21 }
  0xf5   : > { %1689 = dma.hbm_to_vmem [thread:$0]  (!%p2802_p11), %s2515_s7, 128, %s384_s5, %s372_s18  }
  0xf6   : > { %s420_s17 = sshll.u32 %s413_s30, 4  ;;  %s2034_s27 = scalar_lea.hbm %s418_s20, 64  ;;  %s421_s17 = int_to_ptr.vmem [resolvable:$true] %s420_s17 }
  0xf7   : > { %p2035_p1 = scmp.ne.s32.totalorder %s418_s20, %s2034_s27  ;;  %s2039_s22 = scalar_lea.hbm %s2737_s2, 128 }
  0xf8   : > { %p2040_p0 = scmp.lt.u32.totalorder %s418_s20, %s2737_s2  ;;  %p2041_p5 = scmp.lt.u32.totalorder %s2039_s22, %s2034_s27 }
  0xf9   : > { %p2037_p7 = pnand %p2035_p1, %p2801_p4  ;;  %p2043_p3 = scmp.lt.u32.totalorder %s2034_s27, %s418_s20 }
  0xfa   : > { %p2042_p9 = por %p2041_p5, %p2040_p0 }
  0xfb   : > { %p2038_p10 = pneg %p2037_p7 }
  0xfc   : > { %p2044_p12 = por %p2043_p3, %p2042_p9 }
  0xfe   : > { %p2045_p13 = pnand %p2044_p12, %p2038_p10 }
 0x100   : > { %2048 = shalt.err (!%p2045_p13)
}
 0x101   : > { %s2049_s3 = scalar_lea.vmem %s421_s17, 64  ;;  %s2174_s5 = smov [#allocation7]  }
 0x102   : > { %p2050_p6 = scmp.ne.s32.totalorder %s421_s17, %s2049_s3  ;;  %s2054_s1 = sshll.u32 %s2174_s5, 4  ;;  %s2055_s1 = int_to_ptr.vmem [resolvable:$false] %s2054_s1 }
 0x103   : > { %s2056_s18 = scalar_lea.vmem %s2055_s1, 128  ;;  %p2057_p1 = scmp.lt.s32.totalorder %s421_s17, %s2055_s1 }
 0x104   : > { %p2052_p2 = pnand %p2050_p6, %p2801_p4  ;;  %p2058_p7 = scmp.lt.s32.totalorder %s2056_s18, %s2049_s3 }
 0x106   : > { %p2053_p8 = pneg %p2052_p2  ;;  %p2059_p11 = por %p2058_p7, %p2057_p1 }
 0x108   : > { %p2060_p0 = pnand %p2059_p11, %p2053_p8 }
 0x10a   : > { %2063 = shalt.err (!%p2060_p0)
}
 0x10b   : > { %p2803_p5 = scmp.ne.s32.totalorder %s2792_s26, 0  ;;  %p2804_p10 = scmp.ne.s32.totalorder %s2778_s16, 0 }
 0x10c   : > { %s2560_s25 = sand.u32 (!%p2804_p10), 1, %s2146_s10   ;;  %p2805_p4 = scmp.ne.s32.totalorder (!%p2804_p10), %s2787_s23, 0 }
 0x10d   : > { %1695 = dma.hbm_to_vmem [thread:$0]  (!%p2803_p5), %s418_s20, 64, %s421_s17, %s2419_s11  }
 0x10e   : > { %429 = sbr.rel (%p2804_p10) target bundleno = 2079 (0x81f), region = 56  ;;  %s2563_s21 = sshll.u32 (!%p2804_p10), %s2560_s25, 3 }
 0x10f   : > { %s432_s30 = scalar_lea.sflag (!%p2804_p10), [#allocation3], %s2560_s25  ;;  %s435_s28 = scalar_lea.vmem (!%p2804_p10), [#allocation2], %s2563_s21 }
 0x115   : > { %2117 = dma.done.wait (%p2805_p4), %s432_s30, 128  }
 0x116   : > { %2119 = vsyncadd (%p2805_p4), %s432_s30, 4294967168  ;;  %s440_s11 = sand.u32 1, %s2265_s15   ;;  %s444_s26 = scalar_lea.vmem [#allocation5], %s2563_s21 }
 0x117   : > { %s441_s16 = scalar_lea.sflag [#allocation6], %s440_s11 }
 0x118   : > { %2121 = dma.done.wait (%p2805_p4), %s441_s16, 192  }
 0x119   : > { %2123 = vsyncadd (%p2805_p4), %s441_s16, 4294967104  ;;  %s1485_s17 = sshll.u32 %s2560_s25, 2  ;;  %p2806_p11 = scmp.eq.s32.totalorder %s2265_s15, 0 }
 0x11a   : > { %s453_s14 = scalar_lea.vmem [#allocation7], %s1485_s17 }
 0x11b   : > { %2125 = dma.done.wait (%p2806_p11), [#allocation9], 32   ;;  %p2807_p9 = pmov %p2806_p11 }
 0x11d   : > { %2127 = vsyncadd (%p2807_p9), [#allocation9], 4294967264  ;;  %p2808_p3 = pmov %p2807_p9 }
 0x11f   : > { %2129 = dma.done.wait (%p2808_p3), [#allocation12], 512   ;;  %p2809_p12 = pmov %p2808_p3 }
 0x120   : > { %p2810_p13 = pmov %p2808_p3 }
 0x121   : > { %2131 = vsyncadd (%p2809_p12), [#allocation12], 4294966784 }
 0x122   : > { %2133 = dma.done.wait (%p2810_p13), [#allocation15], 768   ;;  %p2811_p6 = pmov %p2808_p3 }
 0x123   : > { %vm524_vm0 = vcmask 261120   ;;  %v523_v0 = vld [vmem:[%s435_s28] sm:$0xff]  ;;  %v2175_v8 = vmov 0.0   ;;  %vm2176_vm1 = vmmov 0   ;;  %v1781_v12 = vld [vmem:[#allocation11 + $0x8] sm:$0xff]   ;;  %vm757_vm2 = vcmask 130048  }
 0x124   : > { %2135 = vsyncadd (%p2811_p6), [#allocation15], 4294966528  ;;  %v525_v1 = vsel %vm524_vm0, %v523_v0, 0.0  ;;  %v1778_v7 = vld [vmem:[#allocation13] sm:$0xff]   ;;  %1559 = vmatprep.subr.bf16.mxu1 %v2175_v8  ;;  %1551 = vmatprep.subr.bf16.mxu0 %v2175_v8  ;;  %v1779_v9 = vld [vmem:[#allocation13 + $0x8] sm:$0xff]   ;;  %s2177_s15 = smov 112  }
 0x125   : > { %526 = vadd.xlane.f32.xlu0 %v525_v1  ;;  %1560 = vmatpush3.bf16.msra.mxu1 %v1778_v7  ;;  %v1780_v10 = vld [vmem:[#allocation11] sm:$0xff]   ;;  %v556_v11 = vld [vmem:[%s453_s14] sm:$0xf]  ;;  %v1493_v17 = vld [vmem:[#allocation8] ss:$0 sm:$0xff]  ;;  %s2178_s23 = smov 96  }
 0x126   : > { %1561 = vmatprep.subr.bf16.mxu1 %v2175_v8  ;;  %1563 = vmatprep.mubr.msk.bf16.mxu1 %vm2176_vm1, %v2175_v8  ;;  %v1494_v19 = vld [vmem:[#allocation10] ss:$0 sm:$0xff]  ;;  %s2179_s20 = smov 80   ;;  %v1782_v29 = vld [vmem:[#allocation14] sm:$0xff]   ;;  %v1783_v30 = vld [vmem:[#allocation14 + $0x8] sm:$0xff]   ;;  %vm994_vm3 = vcmask 1043456  }
 0x127   : > { %1555 = vmatprep.mubr.msk.bf16.mxu0 %vm2176_vm1, %v2175_v8  ;;  %1552 = vmatpush3.bf16.msra.mxu0 %v1780_v10  ;;  %v756_v52 = vld [vmem:[%s444_s26] sm:$0xff]  ;;  %vm942_vm4 = vcmask 64512   ;;  %s2180_s27 = smov 32   ;;  %s2181_s29 = smov 16   ;;  %vm1190_vm5 = vcmask 392192   ;;  %vm1225_vm6 = vcmask 523264  }
 0x128   : > { %1553 = vmatprep.subr.bf16.mxu0 %v2175_v8  ;;  %s2182_s19 = smov 48   ;;  %s1518_s22 = sshll.u32 %s2154_s12, 7 }
 0x129   : > { %1562 = vmatpush3.bf16.msra.mxu1 %v1779_v9  ;;  %s521_s9 = scalar_lea.vmem [#allocation17], %s2563_s21  ;;  %s2812_s1 = sld [smem:[#allocation34_spill]] }
 0x12a   : > { %1575 = vmatprep.subr.bf16.mxu1 %v2175_v8  ;;  %s1285_s7 = sshll.u32 %s521_s9, 4  ;;  %s1271_s30 = scalar_lea.sflag [#allocation4], %s2560_s25  ;;  %s2687_s7 = int_to_ptr.vmem [resolvable:$true] %s1285_s7 }
 0x12b   : > { %1554 = vmatpush3.bf16.msra.mxu0 %v1781_v12  ;;  %s2064_s28 = scalar_lea.vmem %s2687_s7, 128  ;;  %p2813_p8 = scmp.ne.s32.totalorder %s2788_s24, 0 }
 0x12c   : > { %1564 = vmatmul.mubr.msk.bf16.vlgmr.msra.gmra.mrb[0].mxu1 %vm524_vm0, %v556_v11  ;;  %1567 = vmatprep.subr.bf16.mxu0 %v2175_v8  ;;  %p2065_p2 = scmp.ne.s32.totalorder %s2687_s7, %s2064_s28  ;;  %s2183_s12 = smov [#allocation17]  }
 0x12d   : > { %1577 = vmatprep.mubr.msk.bf16.mxu1 %vm2176_vm1, %v2175_v8  ;;  %s2068_s21 = sshll.u32 %s2183_s12, 4  ;;  %s2069_s21 = int_to_ptr.vmem [resolvable:$false] %s2068_s21 }
 0x12e   : > { %p2066_p1 = pnand %p2065_p2, %p2813_p8  ;;  %s2070_s11 = scalar_lea.vmem %s2069_s21, 256 }
 0x12f   : > { %s2685_s18 = scalar_lea.hbm %s2812_s1, %s1518_s22  ;;  %p2071_p0 = scmp.lt.s32.totalorder %s2687_s7, %s2069_s21 }
 0x130   : > { %p2067_p7 = pneg %p2066_p1  ;;  %p2072_p5 = scmp.lt.s32.totalorder %s2070_s11, %s2064_s28 }
 0x132   : > { %p2073_p10 = por %p2072_p5, %p2071_p0 }
 0x134   : > { %p2074_p4 = pnand %p2073_p10, %p2067_p7 }
 0x1b2   : > { %v527_v2 = vpop.xlane.xlu0 %526 }
 0x1b3   : > { %v529_v3 = vmul.f32 0.03125, %v527_v2 }
 0x1b5   : > { %v530_v4 = vsub.f32 %v523_v0, %v529_v3 }
 0x1b7   : > { %v531_v5 = vmul.f32 %v530_v4, %v530_v4 }
 0x1b9   : > { %v532_v6 = vsel %vm524_vm0, %v531_v5, 0.0 }
 0x1ba   : > { %533 = vadd.xlane.f32.xlu0 %v532_v6 }
 0x1ff   : > { %v669_v23 = vpop.f32.mrb[0].mxu1 }
 0x200   : > { %v733_v24 = vpack.c.bf16 %v669_v23, %v669_v23  ;;  %v1565_v25 = vpop.f32.mrb[1].mxu1 }
 0x201   : > { %v672_v26 = vpop.f32.mrb[2].mxu1 }
 0x202   : > { %743 = vrot.lane.b32.xlu1 %v733_v24, %s2177_s15  ;;  %v1566_v27 = vpop.f32.mrb[3].mxu1  ;;  %v762_v28 = vsel %vm757_vm2, %v733_v24, 0 }
 0x203   : > { %1576 = vmatpush3.bf16.xpose.msra.mxu1 %v762_v28 }
 0x204   : > { %1587 = vmatprep.subr.bf16.mxu1 %v2175_v8 }
 0x206   : > { %745 = vrot.lane.b32.xlu1 %v733_v24, %s2178_s23 }
 0x20a   : > { %747 = vrot.lane.b32.xlu1 %v733_v24, %s2179_s20 }
 0x247   : > { %v534_v13 = vpop.xlane.xlu0 %533 }
 0x248   : > { %v535_v14 = vmul.f32 0.03125, %v534_v13 }
 0x24a   : > { %v536_v15 = vadd.f32 1e-05, %v535_v14 }
 0x24c   : > { %1788 = vrsqrt.f32 %v536_v15 }
 0x256   : > { %v1789_v16 = vpop.eup %1788 }
 0x257   : > { %v538_v18 = vmul.f32 %v1789_v16, %v530_v4 }
 0x259   : > { %v546_v20 = vmul.f32 %v1493_v17, %v538_v18 }
 0x25b   : > { %v554_v21 = vadd.f32 %v1494_v19, %v546_v20 }
 0x25d   : > { %v555_v22 = vpack.c.bf16 %v554_v21, %v554_v21 }
 0x25f   : > { %1556 = vmatmul.mubr.msk.bf16.vlgmr.msra.gmra.mrb[0].mxu0 %vm524_vm0, %v555_v22 }
 0x260   : > { %1571 = vmatprep.mubr.msk.bf16.mxu0 %vm2176_vm1, %v2175_v8  ;;  %1568 = vmatpush3.bf16.msra.mxu0 %v1782_v29 }
 0x261   : > { %1569 = vmatprep.subr.bf16.mxu0 %v2175_v8 }
 0x264   : > { %1570 = vmatpush3.bf16.msra.mxu0 %v1783_v30 }
 0x265   : > { %1581 = vmatprep.subr.bf16.mxu0 %v2175_v8 }
 0x267   : > { %1572 = vmatmul.mubr.msk.bf16.vlgmr.msra.gmra.mrb[4].mxu0 %vm524_vm0, %v556_v11 }
 0x268   : > { %1583 = vmatprep.mubr.msk.bf16.mxu0 %vm2176_vm1, %v2175_v8 }
 0x274   : > { %v744_v31 = vpop.permute.xlu1 %743 }
 0x275   : > { %v808_v32 = vsel %vm757_vm2, %v744_v31, 0 }
 0x276   : > { %1582 = vmatpush3.bf16.xpose.msra.mxu0 %v808_v32 }
 0x277   : > { %1593 = vmatprep.subr.bf16.mxu0 %v2175_v8 }
 0x278   : > { %v746_v39 = vpop.permute.xlu1 %745 }
 0x279   : > { %v854_v40 = vsel %vm757_vm2, %v746_v39, 0 }
 0x27c   : > { %v748_v45 = vpop.permute.xlu1 %747 }
 0x27d   : > { %v900_v50 = vsel %vm757_vm2, %v748_v45, 0 }
 0x332   : > { %v610_v33 = vpop.f32.mrb[0].mxu0 }
 0x333   : > { %v731_v34 = vmul.f32 0.25, %v610_v33  ;;  %v1557_v35 = vpop.f32.mrb[1].mxu0 }
 0x334   : > { %v613_v36 = vpop.f32.mrb[2].mxu0 }
 0x335   : > { %v732_v37 = vpack.c.bf16 %v731_v34, %v731_v34  ;;  %v1558_v38 = vpop.f32.mrb[3].mxu0 }
 0x337   : > { %738 = vrot.lane.b32.xlu1 %v732_v37, %s2178_s23  ;;  %736 = vrot.lane.b32.xlu0 %v732_v37, %s2177_s15 }
 0x338   : > { %1578 = vmatmul.mubr.msk.bf16.vlgmr.msra.gmra.mrb[4].mxu1 %vm757_vm2, %v732_v37 }
 0x339   : > { %1588 = vmatpush3.bf16.xpose.msra.mxu1 %v854_v40  ;;  %1589 = vmatprep.mubr.msk.bf16.mxu1 %vm2176_vm1, %v2175_v8 }
 0x33a   : > { %1599 = vmatprep.subr.bf16.mxu1 %v2175_v8  ;;  %v725_v41 = vpop.f32.mrb[4].mxu0 }
 0x33b   : > { %740 = vrot.lane.b32.xlu1 %v732_v37, %s2179_s20  ;;  %v1573_v42 = vpop.f32.mrb[5].mxu0  ;;  %v2628_v46 = vpack.c.bf16 %v725_v41, %v725_v41 }
 0x33c   : > { %v728_v43 = vpop.f32.mrb[6].mxu0 }
 0x33d   : > { %v1574_v44 = vpop.f32.mrb[7].mxu0  ;;  %v996_v49 = vsel %vm994_vm3, %v2628_v46, 0 }
 0x3a9   : > { %v739_v47 = vpop.permute.xlu1 %738  ;;  %v737_v48 = vpop.permute.xlu0 %736 }
 0x3aa   : > { %1584 = vmatmul.mubr.msk.bf16.vlgmr.msra.gmra.mrb[8].mxu0 %vm757_vm2, %v737_v48  ;;  %1590 = vmatmul.mubr.msk.bf16.vlgmr.msra.gmra.mrb[8].mxu1 %vm757_vm2, %v739_v47 }
 0x3ab   : > { %1594 = vmatpush3.bf16.xpose.msra.mxu0 %v900_v50  ;;  %1595 = vmatprep.mubr.msk.bf16.mxu0 %vm2176_vm1, %v2175_v8 }
 0x3ac   : > { %1600 = vmatpush3.bf16.msra.mxu1 %v996_v49  ;;  %1601 = vmatprep.mubr.msk.bf16.mxu1 %vm2176_vm1, %v2175_v8 }
 0x3ad   : > { %1605 = vmatprep.subr.bf16.mxu0 %v2175_v8  ;;  %1611 = vmatprep.subr.bf16.mxu1 %v2175_v8  ;;  %v741_v51 = vpop.permute.xlu1 %740 }
 0x3b2   : > { %1596 = vmatmul.mubr.msk.bf16.vlgmr.msra.gmra.mrb[12].mxu0 %vm757_vm2, %v741_v51 }
 0x3b3   : > { %1607 = vmatprep.mubr.msk.bf16.mxu0 %vm2176_vm1, %v2175_v8 }
 0x40b   : > { %v798_v53 = vpop.f32.mrb[4].mxu1 }
 0x40c   : > { %v799_v54 = vadd.f32 %v798_v53, %v756_v52  ;;  %v1579_v55 = vpop.f32.mrb[5].mxu1 }
 0x40d   : > { %v801_v56 = vpop.f32.mrb[6].mxu1 }
 0x40e   : > { %v1580_v57 = vpop.f32.mrb[7].mxu1  ;;  %v943_v58 = vsel %vm942_vm4, %v799_v54, -inf }
 0x40f   : > { %944 = vmax.xlane.f32.xlu1 %v943_v58 }
 0x47d   : > { %v844_v59 = vpop.f32.mrb[8].mxu0  ;;  %v890_v60 = vpop.f32.mrb[8].mxu1 }
 0x47e   : > { %v845_v61 = vadd.f32 %v844_v59, %v756_v52  ;;  %v891_v62 = vadd.f32 %v890_v60, %v756_v52  ;;  %v1585_v63 = vpop.f32.mrb[9].mxu0  ;;  %v1591_v0 = vpop.f32.mrb[9].mxu1  ;;  %v1784_v60 = vld [vmem:[#allocation16] sm:$0xff]  }
 0x47f   : > { %v847_v1 = vpop.f32.mrb[10].mxu0  ;;  %v893_v2 = vpop.f32.mrb[10].mxu1 }
 0x480   : > { %v1586_v3 = vpop.f32.mrb[11].mxu0  ;;  %v1592_v4 = vpop.f32.mrb[11].mxu1  ;;  %v949_v5 = vsel %vm942_vm4, %v891_v62, -inf  ;;  %v946_v6 = vsel %vm942_vm4, %v845_v61, -inf }
 0x481   : > { %950 = vmax.xlane.f32.xlu1 %v949_v5  ;;  %947 = vmax.xlane.f32.xlu0 %v946_v6 }
 0x485   : > { %v936_v7 = vpop.f32.mrb[12].mxu0 }
 0x486   : > { %v937_v9 = vadd.f32 %v936_v7, %v756_v52  ;;  %v1597_v10 = vpop.f32.mrb[13].mxu0  ;;  %v1787_v7 = vld [vmem:[#allocation16 + $0x18] sm:$0xff]  }
 0x487   : > { %v939_v11 = vpop.f32.mrb[14].mxu0 }
 0x488   : > { %v1598_v12 = vpop.f32.mrb[15].mxu0  ;;  %v952_v13 = vsel %vm942_vm4, %v937_v9, -inf }
 0x489   : > { %953 = vmax.xlane.f32.xlu1 %v952_v13 }
 0x49c   : > { %v945_v14 = vpop.xlane.xlu1 %944 }
 0x49d   : > { %v955_v15 = vsub.f32 %v799_v54, %v945_v14 }
 0x49f   : > { %v959_v16 = vmul.f32 1.442695, %v955_v15 }
 0x4a1   : > { %1790 = vpow2.f32 %v959_v16 }
 0x4ab   : > { %v1791_v17 = vpop.eup %1790 }
 0x4ac   : > { %v967_v18 = vsel %vm942_vm4, %v1791_v17, 0.0 }
 0x4ad   : > { %968 = vadd.xlane.f32.xlu0 %v967_v18 }
 0x50e   : > { %v951_v19 = vpop.xlane.xlu1 %950  ;;  %v948_v20 = vpop.xlane.xlu0 %947 }
 0x50f   : > { %v957_v21 = vsub.f32 %v891_v62, %v951_v19  ;;  %v956_v22 = vsub.f32 %v845_v61, %v948_v20  ;;  %v1785_v61 = vld [vmem:[#allocation16 + $0x8] sm:$0xff]   ;;  %v1786_v62 = vld [vmem:[#allocation16 + $0x10] sm:$0xff]  }
 0x511   : > { %v963_v23 = vmul.f32 1.442695, %v957_v21  ;;  %v961_v24 = vmul.f32 1.442695, %v956_v22 }
 0x513   : > { %1792 = vpow2.f32 %v963_v23 }
 0x514   : > { %1794 = vpow2.f32 %v961_v24 }
 0x516   : > { %v954_v30 = vpop.xlane.xlu1 %953 }
 0x517   : > { %v958_v31 = vsub.f32 %v937_v9, %v954_v30 }
 0x519   : > { %v965_v32 = vmul.f32 1.442695, %v958_v31 }
 0x51d   : > { %v1793_v25 = vpop.eup %1792 }
 0x51e   : > { %v1795_v26 = vpop.eup %1794  ;;  %v973_v27 = vsel %vm942_vm4, %v1793_v25, 0.0 }
 0x51f   : > { %974 = vadd.xlane.f32.xlu0 %v973_v27  ;;  %v970_v28 = vsel %vm942_vm4, %v1795_v26, 0.0 }
 0x520   : > { %971 = vadd.xlane.f32.xlu1 %v970_v28 }
 0x531   : > { %752 = vrot.lane.b32.xlu1 %v2628_v46, %s2178_s23 }
 0x535   : > { %750 = vrot.lane.b32.xlu0 %v2628_v46, %s2177_s15 }
 0x53a   : > { %v969_v29 = vpop.xlane.xlu0 %968 }
 0x53b   : > { %1796 = vrcp.f32 %v969_v29 }
 0x53c   : > { %1798 = vpow2.f32 %v965_v32 }
 0x545   : > { %v1797_v33 = vpop.eup %1796 }
 0x546   : > { %v983_v34 = vmul.f32 %v1797_v33, %v1791_v17  ;;  %v1799_v36 = vpop.eup %1798 }
 0x547   : > { %v976_v37 = vsel %vm942_vm4, %v1799_v36, 0.0 }
 0x548   : > { %v987_v35 = vpack.c.bf16 %v983_v34, %v983_v34 }
 0x54a   : > { %1602 = vmatmul.mubr.msk.bf16.vlgmr.msra.gmra.mrb[12].mxu1 %vm942_vm4, %v987_v35 }
 0x54b   : > { %1613 = vmatprep.mubr.msk.bf16.mxu1 %vm2176_vm1, %v2175_v8 }
 0x555   : > { %977 = vadd.xlane.f32.xlu1 %v976_v37 }
 0x566   : > { %754 = vrot.lane.b32.xlu1 %v2628_v46, %s2179_s20 }
 0x5ac   : > { %v975_v38 = vpop.xlane.xlu0 %974 }
 0x5ad   : > { %1800 = vrcp.f32 %v975_v38  ;;  %v972_v39 = vpop.xlane.xlu1 %971 }
 0x5ae   : > { %1802 = vrcp.f32 %v972_v39 }
 0x5b0   : > { %v751_v40 = vpop.permute.xlu0 %750 }
 0x5b1   : > { %v1042_v41 = vsel %vm994_vm3, %v751_v40, 0  ;;  %v753_v42 = vpop.permute.xlu1 %752 }
 0x5b2   : > { %v1088_v43 = vsel %vm994_vm3, %v753_v42, 0  ;;  %1606 = vmatpush3.bf16.msra.mxu0 %v1042_v41 }
 0x5b3   : > { %1612 = vmatpush3.bf16.msra.mxu1 %v1088_v43  ;;  %1617 = vmatprep.subr.bf16.mxu0 %v2175_v8 }
 0x5b4   : > { %1623 = vmatprep.subr.bf16.mxu1 %v2175_v8 }
 0x5b7   : > { %v1801_v44 = vpop.eup %1800 }
 0x5b8   : > { %v1803_v45 = vpop.eup %1802  ;;  %v985_v47 = vmul.f32 %v1801_v44, %v1793_v25 }
 0x5b9   : > { %v984_v46 = vmul.f32 %v1803_v45, %v1795_v26 }
 0x5ba   : > { %v989_v48 = vpack.c.bf16 %v985_v47, %v985_v47 }
 0x5bb   : > { %v988_v49 = vpack.c.bf16 %v984_v46, %v984_v46 }
 0x5bc   : > { %1614 = vmatmul.mubr.msk.bf16.vlgmr.msra.gmra.mrb[16].mxu1 %vm942_vm4, %v989_v48 }
 0x5bd   : > { %1608 = vmatmul.mubr.msk.bf16.vlgmr.msra.gmra.mrb[16].mxu0 %vm942_vm4, %v988_v49  ;;  %1631 = vmatprep.mubr.msk.bf16.mxu1 %vm2176_vm1, %v2175_v8 }
 0x5be   : > { %1619 = vmatprep.mubr.msk.bf16.mxu0 %vm2176_vm1, %v2175_v8  ;;  %1624 = vmatpush3.bf16.msra.mxu1 %v1784_v60 }
 0x5bf   : > { %1625 = vmatprep.subr.bf16.mxu1 %v2175_v8 }
 0x5c2   : > { %1626 = vmatpush3.bf16.msra.mxu1 %v1785_v61 }
 0x5c3   : > { %1627 = vmatprep.subr.bf16.mxu1 %v2175_v8 }
 0x5c6   : > { %1628 = vmatpush3.bf16.msra.mxu1 %v1786_v62 }
 0x5c7   : > { %1629 = vmatprep.subr.bf16.mxu1 %v2175_v8 }
 0x5ca   : > { %1630 = vmatpush3.bf16.msra.mxu1 %v1787_v7 }
 0x5e2   : > { %v978_v50 = vpop.xlane.xlu1 %977 }
 0x5e3   : > { %1804 = vrcp.f32 %v978_v50 }
 0x5e6   : > { %v755_v51 = vpop.permute.xlu1 %754 }
 0x5e7   : > { %v1134_v52 = vsel %vm994_vm3, %v755_v51, 0 }
 0x5e8   : > { %1618 = vmatpush3.bf16.msra.mxu0 %v1134_v52 }
 0x5ed   : > { %v1805_v53 = vpop.eup %1804 }
 0x5ee   : > { %v986_v54 = vmul.f32 %v1805_v53, %v1799_v36 }
 0x5f0   : > { %v990_v55 = vpack.c.bf16 %v986_v54, %v986_v54 }
 0x5f2   : > { %1620 = vmatmul.mubr.msk.bf16.vlgmr.msra.gmra.mrb[20].mxu0 %vm942_vm4, %v990_v55 }
 0x61d   : > { %v1032_v56 = vpop.f32.mrb[12].mxu1 }
 0x61e   : > { %v1603_v57 = vpop.f32.mrb[13].mxu1 }
 0x61f   : > { %v1035_v58 = vpop.f32.mrb[14].mxu1 }
 0x620   : > { %v1604_v59 = vpop.f32.mrb[15].mxu1 }
 0x68f   : > { %v1124_v63 = vpop.f32.mrb[16].mxu1 }
 0x690   : > { %v1078_v0 = vpop.f32.mrb[16].mxu0  ;;  %1181 = vrot.lane.b32.xlu1 %v1124_v63, %s2180_s27  ;;  %v1615_v1 = vpop.f32.mrb[17].mxu1 }
 0x691   : > { %1177 = vrot.lane.b32.xlu0 %v1078_v0, %s2181_s29  ;;  %v1609_v2 = vpop.f32.mrb[17].mxu0  ;;  %v1127_v3 = vpop.f32.mrb[18].mxu1 }
 0x692   : > { %v1081_v4 = vpop.f32.mrb[18].mxu0  ;;  %v1616_v5 = vpop.f32.mrb[19].mxu1 }
 0x693   : > { %v1610_v6 = vpop.f32.mrb[19].mxu0 }
 0x6c5   : > { %v1170_v9 = vpop.f32.mrb[20].mxu0 }
 0x6c6   : > { %1185 = vrot.lane.b32.xlu0 %v1170_v9, %s2182_s19  ;;  %v1621_v10 = vpop.f32.mrb[21].mxu0 }
 0x6c7   : > { %v1173_v8 = vpop.f32.mrb[22].mxu0 }
 0x6c8   : > { %v1622_v11 = vpop.f32.mrb[23].mxu0 }
 0x702   : > { %v1182_v13 = vpop.permute.xlu1 %1181 }
 0x703   : > { %v1178_v12 = vpop.permute.xlu0 %1177 }
 0x704   : > { %v1188_v14 = vsel %vm757_vm2, %v1032_v56, %v1178_v12 }
 0x705   : > { %v1189_v15 = vsel %vm524_vm0, %v1188_v14, %v1182_v13 }
 0x738   : > { %v1186_v16 = vpop.permute.xlu0 %1185 }
 0x739   : > { %v1191_v17 = vsel %vm1190_vm5, %v1189_v15, %v1186_v16 }
 0x73a   : > { %v1192_v18 = vpack.c.bf16 %v1191_v17, %v1191_v17 }
 0x73c   : > { %1632 = vmatmul.mubr.msk.bf16.vlgmr.msra.gmra.mrb[20].mxu1 %vm1225_vm6, %v1192_v18 }
 0x80f   : > { %v1263_v19 = vpop.f32.mrb[20].mxu1 }
 0x810   : > { %1269 = vst.msk [vmem:[%s521_s9] sm:$0xff] %vm524_vm0, %v1263_v19  ;;  %v1633_v20 = vpop.f32.mrb[21].mxu1 }
 0x811   : > { %v1266_v21 = vpop.f32.mrb[22].mxu1 }
 0x812   : > { %2077 = shalt.err (!%p2074_p4)
}
 0x813   : > { %s2078_s25 = scalar_lea.hbm %s2685_s18, 128  ;;  %s2082_s17 = scalar_lea.hbm %s2812_s1, 256 }
 0x814   : > { %p2079_p11 = scmp.ne.s32.totalorder %s2685_s18, %s2078_s25  ;;  %p2083_p12 = scmp.lt.u32.totalorder %s2685_s18, %s2812_s1 }
 0x815   : > { %p2084_p13 = scmp.lt.u32.totalorder %s2082_s17, %s2078_s25  ;;  %p2086_p2 = scmp.lt.u32.totalorder %s2078_s25, %s2685_s18 }
 0x816   : > { %p2080_p9 = pnand %p2079_p11, %p2813_p8 }
 0x817   : > { %p2085_p6 = por %p2084_p13, %p2083_p12 }
 0x818   : > { %p2081_p3 = pneg %p2080_p9 }
 0x819   : > { %p2087_p1 = por %p2086_p2, %p2085_p6 }
 0x81b   : > { %p2088_p7 = pnand %p2087_p1, %p2081_p3 }
 0x81d   : > { %2091 = shalt.err (!%p2088_p7)
}
 0x81e   : > { %1665 = dma.vmem_to_hbm [thread:$0]  (%p2813_p8), %s2687_s7, 128, %s2685_s18, %s1271_s30   ;;  %v1634_v22 = vpop.f32.mrb[23].mxu1 }
 0x81f PF: > { %s2814_s23 = sld [smem:[#allocation24_spill]]  ;;  %s2815_s20 = sld [smem:[#allocation29_spill]] }
 0x820   : > { %s2816_s27 = sld [smem:[#allocation26_spill]] }
 0x825   : > { %s1297_s29 = sand.u32 1, %s2814_s23   ;;  %p2817_p0 = scmp.ne.s32.totalorder %s2815_s20, 0 }
 0x826   : > { %p2818_p5 = scmp.ge.s32.totalorder %s2816_s27, 2  ;;  %s1298_s19 = scalar_lea.sflag [#allocation4], %s1297_s29 }
 0x828   : > { %p1697_p10 = pnand %p2818_p5, %p2817_p0 }
 0x82a   : > { %2137 = dma.done.wait (!%p1697_p10), %s1298_s19, 128  }
 0x82b   : > { %2139 = vsyncadd (!%p1697_p10), %s1298_s19, 4294967168  ;;  %s31_s14 = sadd.s32 1, %s2816_s27   ;;  %s2819_s24 = sld [smem:[#allocation25_spill]] }
 0x82c   : > { %p28_p4 = scmp.ge.s32.totalorder %s31_s14, 4   ;;  %s2820_s11 = sld [smem:[#allocation28_spill]] }
 0x82d   : > { %s2821_s22 = sld [smem:[#allocation27_spill]]  ;;  %s2822_s30 = smov %s2146_s10 }
 0x82e   : > { %s2824_s12 = smov %s2158_s13  ;;  %30 = sbr.rel (!%p28_p4) target bundleno = 17 (0x11), region = 149 }
 0x831   : > { %s2823_s10 = smov %s2819_s24 }
 0x833   : > { %s2825_s13 = smov %s2821_s22 }
 0x835   :  { %1303 = vsyncpa [#allocation3], 1 }
 0x836   :  { %1305 = vsyncpa [#allocation3 + $0x1], 1 }
 0x837   :  { %1306 = vsyncpa [#allocation6], 1 }
 0x838   :  { %1308 = vsyncpa [#allocation6 + $0x1], 1 }
 0x839   :  { %1309 = vsyncpa [#allocation9], 1 }
 0x83a   :  { %1310 = vsyncpa [#allocation12], 1 }
 0x83b   :  { %1311 = vsyncpa [#allocation15], 1 }
 0x83c   :  { %1312 = vsyncpa [#allocation4], 1 }
 0x83d   :  { %1314 = vsyncpa [#allocation4 + $0x1], 1 }

</bundles_post_ra>
